<compile_context>
chip_gen: v7x
topology: tpu7x:2x2x1
jax: 0.10.0
libtpu: 0.0.40
codegen_flags: <defaults>
</compile_context>

<pallas_src>
import math

import jax
import jax.numpy as jnp
from jax.experimental import pallas as pl
from jax.experimental.pallas import tpu as pltpu


def _round_up(x, m):
    return ((x + m - 1) // m) * m


def _vmem_capacity_bytes():
    try:
        return int(pltpu.get_tpu_info().vmem_capacity_bytes)
    except Exception:
        return 64 * 1024 * 1024  # v7x (smallest physical VMEM) as conservative default


# ----------------------------------------------------------------------------
# Kernels
# ----------------------------------------------------------------------------
def _ffn_resident_kernel(x_ref, w1_ref, b1_ref, w2_ref, b2_ref, o_ref):
    # x_ref: (TR, d_model)   w1_ref: (d_model, d_ff) bf16 (VMEM-resident)
    # b1_ref: (1, d_ff) f32  w2_ref: (d_ff, d_model) bf16 (VMEM-resident)
    # b2_ref: (1, d_model) f32   o_ref: (TR, d_model)
    x = x_ref[...].astype(w1_ref.dtype)
    h = jnp.dot(x, w1_ref[...], preferred_element_type=jnp.float32)
    h = jnp.maximum(h + b1_ref[...], 0.0)
    # TODO(synk): dropout is identity here (eval-mode forward); see header note.
    out = jnp.dot(h.astype(w2_ref.dtype), w2_ref[...],
                  preferred_element_type=jnp.float32)
    o_ref[...] = (out + b2_ref[...]).astype(o_ref.dtype)


def _ffn_split_kernel(x_ref, w1_ref, b1_ref, w2_ref, b2_ref, o_ref, acc_ref):
    # Fallback when the full weights do not fit VMEM: the d_ff reduction of
    # linear_2 is the last grid axis, accumulated in an f32 VMEM scratch.
    j = pl.program_id(1)

    @pl.when(j == 0)
    def _init():
        acc_ref[...] = jnp.zeros_like(acc_ref)

    x = x_ref[...].astype(w1_ref.dtype)
    h = jnp.dot(x, w1_ref[...], preferred_element_type=jnp.float32)
    h = jnp.maximum(h + b1_ref[...], 0.0)
    # TODO(synk): dropout is identity here (eval-mode forward); see header note.
    acc_ref[...] += jnp.dot(h.astype(w2_ref.dtype), w2_ref[...],
                            preferred_element_type=jnp.float32)

    @pl.when(j == pl.num_programs(1) - 1)
    def _finalize():
        o_ref[...] = (acc_ref[...] + b2_ref[...]).astype(o_ref.dtype)


# ----------------------------------------------------------------------------
# Wrappers
# ----------------------------------------------------------------------------
def prepare_ffn_params(w1, b1, w2, b2, compute_dtype=jnp.bfloat16):
    """One-time layout/dtype plumbing, hoisted out of the hot path.

    w1: (d_ff, d_model), b1: (d_ff,)   -- PyTorch nn.Linear layout
    w2: (d_model, d_ff), b2: (d_model,)
    Returns (w1t, b1r, w2t, b2r) with weights transposed + cast to compute_dtype.
    """
    d_ff, d_model = w1.shape
    assert w2.shape == (d_model, d_ff), w2.shape
    w1t = jnp.transpose(w1).astype(compute_dtype)        # (d_model, d_ff)
    w2t = jnp.transpose(w2).astype(compute_dtype)        # (d_ff, d_model)
    b1r = b1.reshape(1, d_ff).astype(jnp.float32)
    b2r = b2.reshape(1, d_model).astype(jnp.float32)
    return w1t, b1r, w2t, b2r


def feed_forward_pallas(x, w1t, b1r, w2t, b2r, *,
                        tile_rows=512, tile_ff=None, force_split=False):
    """FeedForward forward pass.  x: (..., d_model); weights from prepare_ffn_params."""
    orig_shape = x.shape
    d_model, d_ff = w1t.shape
    assert orig_shape[-1] == d_model, (orig_shape, d_model)
    assert w2t.shape == (d_ff, d_model), w2t.shape

    x2 = x.reshape(-1, d_model)
    rows = x2.shape[0]

    x_b = x.dtype.itemsize
    w_b = w1t.dtype.itemsize
    out_b = x_b

    cap = _vmem_capacity_bytes()
    usable = cap * 3 // 4

    # --- row tile -------------------------------------------------------------
    tr = min(_round_up(tile_rows, 8), _round_up(rows, 8))
    # Megacore (v7x has 2 TCs): if one tile would swallow >=512 rows, split it in
    # two so the "parallel" rows axis can shard across both cores.
    if rows >= 512 and tr >= rows:
        tr = _round_up(pl.cdiv(rows, 2), 8)
    grid_rows = pl.cdiv(rows, tr)

    weight_bytes = (w1t.size + w2t.size) * w_b + (b1r.size + b2r.size) * 4

    def resident_need(tr_):
        io = 2 * tr_ * d_model * (x_b + out_b)      # double-buffered x + out tiles
        hidden = tr_ * d_ff * (4 + w_b)             # f32 hidden + bf16 copy for dot 2
        return weight_bytes + io + hidden

    def split_need(tr_, tf_):
        wslices = 2 * 2 * d_model * tf_ * w_b       # double-buffered W1^T / W2^T slices
        io = 2 * tr_ * d_model * (x_b + out_b)
        acc = tr_ * d_model * 4
        hidden = tr_ * tf_ * (4 + w_b)
        return wslices + io + acc + hidden + 2 * tf_ * 4

    use_resident = (not force_split) and resident_need(tr) <= usable

    if use_resident:
        need = resident_need(tr)
        vmem_limit = int(min(usable, max(32 * 1024 * 1024, need + need // 2 + (4 << 20))))
        out2 = pl.pallas_call(
            _ffn_resident_kernel,
            out_shape=jax.ShapeDtypeStruct((rows, d_model), x.dtype),
            grid_spec=pltpu.PrefetchScalarGridSpec(
                num_scalar_prefetch=0,
                grid=(grid_rows,),
                in_specs=[
                    pl.BlockSpec((tr, d_model), lambda i: (i, 0)),       # x rows
                    pl.BlockSpec((d_model, d_ff), lambda i: (0, 0)),     # W1^T resident
                    pl.BlockSpec((1, d_ff), lambda i: (0, 0)),           # b1 resident
                    pl.BlockSpec((d_ff, d_model), lambda i: (0, 0)),     # W2^T resident
                    pl.BlockSpec((1, d_model), lambda i: (0, 0)),        # b2 resident
                ],
                out_specs=pl.BlockSpec((tr, d_model), lambda i: (i, 0)),
            ),
            compiler_params=pltpu.CompilerParams(
                dimension_semantics=("parallel",),
                vmem_limit_bytes=vmem_limit,
            ),
        )(x2, w1t, b1r, w2t, b2r)
        return out2.reshape(orig_shape)

    # --- fallback: split d_ff (weights too large to stay resident) -------------
    if tile_ff is not None:
        assert d_ff % tile_ff == 0 and tile_ff % 128 == 0, tile_ff
        tf = tile_ff
    else:
        tf = d_ff
        for cand in (1024, 512, 256, 128):
            if cand <= d_ff and d_ff % cand == 0 and split_need(tr, cand) <= usable:
                tf = cand
                break
    grid_ff = d_ff // tf

    need = split_need(tr, tf)
    vmem_limit = int(min(usable, max(32 * 1024 * 1024, need + need // 2 + (4 << 20))))

    out2 = pl.pallas_call(
        _ffn_split_kernel,
        out_shape=jax.ShapeDtypeStruct((rows, d_model), x.dtype),
        grid_spec=pltpu.PrefetchScalarGridSpec(
            num_scalar_prefetch=0,
            grid=(grid_rows, grid_ff),
            in_specs=[
                pl.BlockSpec((tr, d_model), lambda i, j: (i, 0)),        # x rows
                pl.BlockSpec((d_model, tf), lambda i, j: (0, j)),        # W1^T slice
                pl.BlockSpec((1, tf), lambda i, j: (0, j)),              # b1 slice
                pl.BlockSpec((tf, d_model), lambda i, j: (j, 0)),        # W2^T slice
                pl.BlockSpec((1, d_model), lambda i, j: (0, 0)),         # b2
            ],
            out_specs=pl.BlockSpec((tr, d_model), lambda i, j: (i, 0)),
            scratch_shapes=[pltpu.VMEM((tr, d_model), jnp.float32)],
        ),
        compiler_params=pltpu.CompilerParams(
            dimension_semantics=("parallel", "arbitrary"),
            vmem_limit_bytes=vmem_limit,
        ),
    )(x2, w1t, b1r, w2t, b2r)
    return out2.reshape(orig_shape)


def feed_forward_ref(x, w1, b1, w2, b2):
    """Pure-JAX f32 reference matching the PyTorch module (eval-mode forward)."""
    hi = jax.lax.Precision.HIGHEST
    h = jnp.maximum(jnp.dot(x, w1.T, precision=hi) + b1, 0.0)
    return jnp.dot(h, w2.T, precision=hi) + b2


if __name__ == "__main__":
    d_model, d_ff = 128, 1024   # lane-dense feature dims (small demo sizes)

    key = jax.random.PRNGKey(0)
    k1, k2, k3, k4, kx1, kx2 = jax.random.split(key, 6)

    # nn.Linear default init: U(-1/sqrt(fan_in), 1/sqrt(fan_in))
    lim1 = 1.0 / math.sqrt(d_model)
    lim2 = 1.0 / math.sqrt(d_ff)
    w1 = jax.random.uniform(k1, (d_ff, d_model), jnp.float32, -lim1, lim1)
    b1 = jax.random.uniform(k2, (d_ff,), jnp.float32, -lim1, lim1)
    w2 = jax.random.uniform(k3, (d_model, d_ff), jnp.float32, -lim2, lim2)
    b2 = jax.random.uniform(k4, (d_model,), jnp.float32, -lim2, lim2)

    # One-time weight prep (transpose + bf16 cast) hoisted out of the hot path.
    params = prepare_ffn_params(w1, b1, w2, b2)

    # case 1: rows divide the tile exactly; case 2: ragged row count
    # (exercises the pad-free masked-writeback path).
    x_cases = [
        jax.random.normal(kx1, (2, 8, d_model), dtype=jnp.float32),
        jax.random.normal(kx2, (3, 5, d_model), dtype=jnp.float32),
    ]

    for x in x_cases:
        ref = feed_forward_ref(x, w1, b1, w2, b2)
        # Exercise both the resident plan (default) and the d_ff-split fallback.
        for force_split in (False, True):
            out = jax.block_until_ready(
                feed_forward_pallas(x, *params, force_split=force_split,
                                    tile_ff=256 if force_split else None))
            assert out.shape == x.shape and out.dtype == x.dtype
            max_err = float(jnp.max(jnp.abs(out - ref)))
            assert jnp.allclose(out, ref, atol=2e-2, rtol=2e-2), (force_split, max_err)

    print("KERNEL_OK")
</pallas_src>

<mosaic_0001>
module attributes {stable_mosaic.version = 11 : i64} {
  func.func @_ffn_resident_kernel(%arg0: i32, %arg1: memref<16x128xf32, #tpu.memory_space<vmem>>, %arg2: memref<128x1024xbf16, #tpu.memory_space<vmem>>, %arg3: memref<1x1024xf32, #tpu.memory_space<vmem>>, %arg4: memref<1024x128xbf16, #tpu.memory_space<vmem>>, %arg5: memref<1x128xf32, #tpu.memory_space<vmem>>, %arg6: memref<16x128xf32, #tpu.memory_space<vmem>>) attributes {dimension_semantics = [#tpu.dimension_semantics<parallel>], iteration_bounds = array<i64: 1>, scalar_prefetch = 0 : i64, scratch_operands = 0 : i64, tpu.core_type = #tpu.core_type<tc>, window_params = [{transform_indices = @transform_0, window_bounds = array<i64: 16, 128>}, {pipeline_mode = #tpu.pipeline_mode<synchronous>, transform_indices = @transform_1, window_bounds = array<i64: 128, 1024>}, {pipeline_mode = #tpu.pipeline_mode<synchronous>, transform_indices = @transform_2, window_bounds = array<i64: 1, 1024>}, {pipeline_mode = #tpu.pipeline_mode<synchronous>, transform_indices = @transform_3, window_bounds = array<i64: 1024, 128>}, {pipeline_mode = #tpu.pipeline_mode<synchronous>, transform_indices = @transform_4, window_bounds = array<i64: 1, 128>}, {transform_indices = @transform_5, window_bounds = array<i64: 16, 128>}]} {
    %c0 = arith.constant 0 : index
    %c0_0 = arith.constant 0 : index
    %0 = vector.load %arg1[%c0, %c0_0] : memref<16x128xf32, #tpu.memory_space<vmem>>, vector<16x128xf32>
    %1 = arith.truncf %0 : vector<16x128xf32> to vector<16x128xbf16>
    %c0_1 = arith.constant 0 : index
    %c0_2 = arith.constant 0 : index
    %2 = vector.load %arg2[%c0_1, %c0_2] : memref<128x1024xbf16, #tpu.memory_space<vmem>>, vector<128x1024xbf16>
    %cst = arith.constant dense<0.000000e+00> : vector<16x1024xf32>
    %3 = tpu.matmul %1, %2, %cst {dimension_numbers = #tpu.dot_dimension_numbers<[1], [0], [0], [1], [0, 0, 1, 1], [], []>} : vector<16x128xbf16>, vector<128x1024xbf16>, vector<16x1024xf32> -> vector<16x1024xf32>
    %c0_3 = arith.constant 0 : index
    %c0_4 = arith.constant 0 : index
    %4 = vector.load %arg3[%c0_3, %c0_4] : memref<1x1024xf32, #tpu.memory_space<vmem>>, vector<1x1024xf32>
    %5 = vector.broadcast %4 : vector<1x1024xf32> to vector<16x1024xf32>
    %6 = arith.addf %3, %5 : vector<16x1024xf32>
    %cst_5 = arith.constant 0.000000e+00 : f32
    %7 = vector.broadcast %cst_5 : f32 to vector<16x1024xf32>
    %8 = arith.maximumf %6, %7 : vector<16x1024xf32>
    %9 = arith.truncf %8 : vector<16x1024xf32> to vector<16x1024xbf16>
    %c0_6 = arith.constant 0 : index
    %c0_7 = arith.constant 0 : index
    %10 = vector.load %arg4[%c0_6, %c0_7] : memref<1024x128xbf16, #tpu.memory_space<vmem>>, vector<1024x128xbf16>
    %cst_8 = arith.constant dense<0.000000e+00> : vector<16x128xf32>
    %11 = tpu.matmul %9, %10, %cst_8 {dimension_numbers = #tpu.dot_dimension_numbers<[1], [0], [0], [1], [0, 0, 1, 1], [], []>} : vector<16x1024xbf16>, vector<1024x128xbf16>, vector<16x128xf32> -> vector<16x128xf32>
    %c0_9 = arith.constant 0 : index
    %c0_10 = arith.constant 0 : index
    %12 = vector.load %arg5[%c0_9, %c0_10] : memref<1x128xf32, #tpu.memory_space<vmem>>, vector<1x128xf32>
    %13 = vector.broadcast %12 : vector<1x128xf32> to vector<16x128xf32>
    %14 = arith.addf %11, %13 : vector<16x128xf32>
    %c0_11 = arith.constant 0 : index
    %c0_12 = arith.constant 0 : index
    %15 = vector.load %arg6[%c0_11, %c0_12] : memref<16x128xf32, #tpu.memory_space<vmem>>, vector<16x128xf32>
    tpu.vector_store %arg6[%c0_11, %c0_12], %14 {strides = array<i32>} : memref<16x128xf32, #tpu.memory_space<vmem>>, vector<16x128xf32>,
    return
  }
  func.func @transform_0(%arg0: i32) -> (i32, i32) {
    %c0_i32 = arith.constant 0 : i32
    %c0_i32_0 = arith.constant 0 : i32
    return %arg0, %c0_i32 : i32, i32
  }
  func.func @transform_1(%arg0: i32) -> (i32, i32) {
    %c0_i32 = arith.constant 0 : i32
    %c0_i32_0 = arith.constant 0 : i32
    %c0_i32_1 = arith.constant 0 : i32
    return %c0_i32, %c0_i32_0 : i32, i32
  }
  func.func @transform_2(%arg0: i32) -> (i32, i32) {
    %c0_i32 = arith.constant 0 : i32
    %c0_i32_0 = arith.constant 0 : i32
    %c0_i32_1 = arith.constant 0 : i32
    return %c0_i32, %c0_i32_0 : i32, i32
  }
  func.func @transform_3(%arg0: i32) -> (i32, i32) {
    %c0_i32 = arith.constant 0 : i32
    %c0_i32_0 = arith.constant 0 : i32
    %c0_i32_1 = arith.constant 0 : i32
    return %c0_i32, %c0_i32_0 : i32, i32
  }
  func.func @transform_4(%arg0: i32) -> (i32, i32) {
    %c0_i32 = arith.constant 0 : i32
    %c0_i32_0 = arith.constant 0 : i32
    %c0_i32_1 = arith.constant 0 : i32
    return %c0_i32, %c0_i32_0 : i32, i32
  }
  func.func @transform_5(%arg0: i32) -> (i32, i32) {
    %c0_i32 = arith.constant 0 : i32
    %c0_i32_0 = arith.constant 0 : i32
    return %arg0, %c0_i32 : i32, i32
  }
}

</mosaic_0001>

<bundles_post_ra>
// kernel: tpu_custom_call.1
= control target key start
LH: loop header
LB: loop body
LE: loop exit
PB: predicated region body
PF: predicated region fallthrough
CT: control target
= control target key end

     0   :  { %10 = vsyncpa [#allocation3], 0  ;;  %s1963_s0 = inlined_call_operand.hbm [shape: f32[16,128], index: 0, kind: input, shape index: {}]   ;;  %s1964_s1 = inlined_call_operand.hbm [shape: bf16[128,1024], index: 1, kind: input, shape index: {}]   ;;  %s1965_s2 = inlined_call_operand.hbm [shape: f32[1,1024], index: 2, kind: input, shape index: {}]   ;;  %s1966_s3 = inlined_call_operand.hbm [shape: bf16[1024,128], index: 3, kind: input, shape index: {}]   ;;  %s1967_s4 = inlined_call_operand.vmem [shape: f32[1,128], index: 4, kind: input, shape index: {}]   ;;  %s1968_s5 = inlined_call_operand.hbm [shape: f32[16,128], index: 5, kind: output, shape index: {}]  }
   0x1   :  { %11 = vsyncpa [#allocation6], 0 }
   0x2   :  { %12 = vsyncpa [#allocation9], 0 }
   0x3   :  { %13 = vsyncpa [#allocation4], 0  ;;  %s1815_s18 = smov [#allocation5]   ;;  %s1697_s22 = scalar_lea.hbm %s1964_s1, 8192 }
   0x4   :  { %s31_s19 = sshll.u32 %s1815_s18, 4  ;;  %p1698_p0 = scmp.ne.s32.totalorder %s1964_s1, %s1697_s22  ;;  %s32_s19 = int_to_ptr.vmem [resolvable:$true] %s31_s19 }
   0x5   :  { %p1701_p1 = scmp.lt.u32.totalorder %s1697_s22, %s1964_s1 }
   0x7   :  { %p1703_p2 = pnand %p1701_p1, %p1698_p0 }
   0x9   :  { %1706 = shalt.err (!%p1703_p2)
}
   0xa   :  { %s1707_s27 = scalar_lea.vmem %s32_s19, 8192  ;;  %p1712_p4 = scmp.lt.s32.totalorder %s32_s19, %s32_s19 }
   0xb   :  { %p1708_p3 = scmp.ne.s32.totalorder %s32_s19, %s1707_s27  ;;  %p1713_p5 = scmp.lt.s32.totalorder %s1707_s27, %s1707_s27 }
   0xd   :  { %p1714_p6 = por %p1713_p5, %p1712_p4 }
   0xf   :  { %p1715_p7 = pnand %p1714_p6, %p1708_p3 }
  0x11   :  { %1718 = shalt.err (!%p1715_p7)
}
  0x12   :  { %s1816_s28 = smov 512   ;;  %s1817_s29 = smov 32  }
  0x13   :  { %37 = dma.hbm_to_vmem [thread:$0]  %s1964_s1, 8192, %s32_s19, [#allocation6], %s1816_s28, %s1816_s28, %s1817_s29  }
  0x14   :  { %s1818_s7 = smov [#allocation2]   ;;  %s1719_s11 = scalar_lea.hbm %s1963_s0, 256 }
  0x15   :  { %s19_s8 = sshll.u32 %s1818_s7, 4  ;;  %p1720_p8 = scmp.ne.s32.totalorder %s1963_s0, %s1719_s11  ;;  %s20_s8 = int_to_ptr.vmem [resolvable:$true] %s19_s8 }
  0x16   :  { %p1723_p9 = scmp.lt.u32.totalorder %s1719_s11, %s1963_s0 }
  0x18   :  { %p1725_p10 = pnand %p1723_p9, %p1720_p8 }
  0x1a   :  { %1728 = shalt.err (!%p1725_p10)
}
  0x1b   :  { %s1729_s16 = scalar_lea.vmem %s20_s8, 256  ;;  %p1734_p12 = scmp.lt.s32.totalorder %s20_s8, %s20_s8 }
  0x1c   :  { %p1730_p11 = scmp.ne.s32.totalorder %s20_s8, %s1729_s16  ;;  %p1735_p13 = scmp.lt.s32.totalorder %s1729_s16, %s1729_s16 }
  0x1e   :  { %p1736_p0 = por %p1735_p13, %p1734_p12 }
  0x20   :  { %p1737_p1 = pnand %p1736_p0, %p1730_p11 }
  0x22   :  { %1740 = shalt.err (!%p1737_p1)
}
  0x23   :  { %s1819_s1 = smov 128   ;;  %s1820_s17 = smov 8  }
  0x24   :  { %25 = dma.hbm_to_vmem [thread:$0]  %s1963_s0, 256, %s20_s8, [#allocation3], %s1819_s1, %s1819_s1, %s1820_s17  }
  0x25   :  { %s1821_s20 = smov [#allocation7]   ;;  %s1822_s22 = smov [#allocation8]  }
  0x26   :  { %s44_s21 = sshll.u32 %s1821_s20, 4  ;;  %s53_s23 = sshll.u32 %s1822_s22, 4  ;;  %s45_s21 = int_to_ptr.vmem [resolvable:$true] %s44_s21  ;;  %s1884_s23 = int_to_ptr.vmem [resolvable:$true] %s53_s23 }
  0x27   :  { %s1741_s26 = scalar_lea.hbm %s1965_s2, 128 }
  0x28   :  { %p1742_p2 = scmp.ne.s32.totalorder %s1965_s2, %s1741_s26  ;;  %p1745_p3 = scmp.lt.u32.totalorder %s1741_s26, %s1965_s2 }
  0x2a   :  { %p1747_p4 = pnand %p1745_p3, %p1742_p2 }
  0x2c   :  { %1750 = shalt.err (!%p1747_p4)
}
  0x2d   :  { %s1751_s0 = scalar_lea.vmem %s45_s21, 128  ;;  %p1756_p6 = scmp.lt.s32.totalorder %s45_s21, %s45_s21 }
  0x2e   :  { %p1752_p5 = scmp.ne.s32.totalorder %s45_s21, %s1751_s0  ;;  %p1757_p7 = scmp.lt.s32.totalorder %s1751_s0, %s1751_s0 }
  0x30   :  { %p1758_p8 = por %p1757_p7, %p1756_p6 }
  0x32   :  { %p1759_p9 = pnand %p1758_p8, %p1752_p5 }
  0x34   :  { %1762 = shalt.err (!%p1759_p9)
}
  0x35   :  { %47 = dma.hbm_to_vmem [thread:$0]  %s1965_s2, 128, %s45_s21, [#allocation6]  }
  0x36   :  { %s1763_s10 = scalar_lea.hbm %s1966_s3, 8192 }
  0x37   :  { %p1764_p10 = scmp.ne.s32.totalorder %s1966_s3, %s1763_s10  ;;  %p1767_p11 = scmp.lt.u32.totalorder %s1763_s10, %s1966_s3 }
  0x39   :  { %p1769_p12 = pnand %p1767_p11, %p1764_p10 }
  0x3b   :  { %1772 = shalt.err (!%p1769_p12)
}
  0x3c   :  { %s1773_s15 = scalar_lea.vmem %s1884_s23, 8192  ;;  %p1778_p0 = scmp.lt.s32.totalorder %s1884_s23, %s1884_s23 }
  0x3d   :  { %p1774_p13 = scmp.ne.s32.totalorder %s1884_s23, %s1773_s15  ;;  %p1779_p1 = scmp.lt.s32.totalorder %s1773_s15, %s1773_s15 }
  0x3f   :  { %p1780_p2 = por %p1779_p1, %p1778_p0 }
  0x41   :  { %p1781_p3 = pnand %p1780_p2, %p1774_p13 }
  0x43   :  { %1784 = shalt.err (!%p1781_p3)
}
  0x44   :  { %s1823_s2 = smov 64   ;;  %s1824_s16 = smov 4  }
  0x45   :  { %59 = dma.hbm_to_vmem [thread:$0]  %s1966_s3, 8192, %s1884_s23, [#allocation9], %s1823_s2, %s1823_s2, %s1824_s16  }
  0x46   :  { %1807 = dma.done.wait [#allocation3], 256  }
  0x47   :  { %1808 = vsyncadd [#allocation3], 4294967040 }
  0x48   :  { %1809 = dma.done.wait [#allocation6], 8320  }
  0x49   :  { %1810 = vsyncadd [#allocation6], 4294958976 }
  0x4a   :  { %1811 = dma.done.wait [#allocation9], 8192  }
  0x4b   :  { %1812 = vsyncadd [#allocation9], 4294959104  ;;  %v1825_v0 = vmov 0   ;;  %v78_v1 = vld [vmem:[#allocation5] sm:$0xff]  ;;  %v79_v3 = vld [vmem:[#allocation5 + $0x8] sm:$0xff] }
  0x4c   :  { %536 = vmatprep.mubr.bf16.mxu0 %v1825_v0  ;;  %579 = vmatprep.mubr.bf16.mxu1 %v1825_v0  ;;  %v82_v2 = vld [vmem:[#allocation5 + $0x20] sm:$0xff]  ;;  %v83_v5 = vld [vmem:[#allocation5 + $0x28] sm:$0xff]  ;;  %v80_v60 = vld [vmem:[#allocation5 + $0x10] sm:$0xff] }
  0x4d   :  { %v1405_v4 = vcombine.high %v78_v1, %v82_v2  ;;  %v1404_v6 = vcombine.low %v78_v1, %v82_v2  ;;  %v86_v7 = vld [vmem:[#allocation5 + $0x40] sm:$0xff]  ;;  %v1407_v9 = vcombine.high %v79_v3, %v83_v5  ;;  %v1406_v10 = vcombine.low %v79_v3, %v83_v5  ;;  %v87_v12 = vld [vmem:[#allocation5 + $0x48] sm:$0xff]  ;;  %v84_v63 = vld [vmem:[#allocation5 + $0x30] sm:$0xff] }
  0x4e   :  { %v90_v8 = vld [vmem:[#allocation5 + $0x60] sm:$0xff]  ;;  %v91_v13 = vld [vmem:[#allocation5 + $0x68] sm:$0xff]  ;;  %v75_v2 = vld [vmem:[#allocation2] sm:$0xff] }
  0x4f   :  { %v1413_v11 = vcombine.high %v86_v7, %v90_v8  ;;  %v94_v14 = vld [vmem:[#allocation5 + $0x80] sm:$0xff]  ;;  %504 = vmatprep.subr.bf16.mxu0 %v1405_v4  ;;  %v1415_v15 = vcombine.high %v87_v12, %v91_v13  ;;  %v95_v17 = vld [vmem:[#allocation5 + $0x88] sm:$0xff]  ;;  %547 = vmatprep.subr.bf16.mxu1 %v1407_v9  ;;  %v1412_v19 = vcombine.low %v86_v7, %v90_v8  ;;  %v76_v3 = vld [vmem:[#allocation2 + $0x8] sm:$0xff] }
  0x50   :  { %v98_v16 = vld [vmem:[#allocation5 + $0xa0] sm:$0xff]  ;;  %v99_v18 = vld [vmem:[#allocation5 + $0xa8] sm:$0xff]  ;;  %505 = vmatpush1.bf16.msra.mxu0 %v1404_v6  ;;  %548 = vmatpush1.bf16.msra.mxu1 %v1406_v10  ;;  %v1414_v20 = vcombine.low %v87_v12, %v91_v13  ;;  %v81_v4 = vld [vmem:[#allocation5 + $0x18] sm:$0xff]  ;;  %v1409_v9 = vcombine.high %v80_v60, %v84_v63  ;;  %v1917_v13 = vpack.c.bf16 %v76_v3, %v75_v2 }
  0x51   :  { %506 = vmatprep.subr.bf16.mxu0 %v1413_v11  ;;  %v1421_v21 = vcombine.high %v94_v14, %v98_v16  ;;  %549 = vmatprep.subr.bf16.mxu1 %v1415_v15  ;;  %v1423_v22 = vcombine.high %v95_v17, %v99_v18  ;;  %v102_v23 = vld [vmem:[#allocation5 + $0xc0] sm:$0xff]  ;;  %v103_v25 = vld [vmem:[#allocation5 + $0xc8] sm:$0xff]  ;;  %v1420_v27 = vcombine.low %v94_v14, %v98_v16  ;;  %v85_v5 = vld [vmem:[#allocation5 + $0x38] sm:$0xff] }
  0x52   :  { %v106_v24 = vld [vmem:[#allocation5 + $0xe0] sm:$0xff]  ;;  %v107_v26 = vld [vmem:[#allocation5 + $0xe8] sm:$0xff]  ;;  %v1422_v28 = vcombine.low %v95_v17, %v99_v18  ;;  %v88_v7 = vld [vmem:[#allocation5 + $0x50] sm:$0xff]  ;;  %v1411_v11 = vcombine.high %v81_v4, %v85_v5  ;;  %v1408_v15 = vcombine.low %v80_v60, %v84_v63  ;;  %v1410_v17 = vcombine.low %v81_v4, %v85_v5 }
  0x53   :  { %v1429_v29 = vcombine.high %v102_v23, %v106_v24  ;;  %v1431_v30 = vcombine.high %v103_v25, %v107_v26  ;;  %v110_v31 = vld [vmem:[#allocation5 + $0x100] sm:$0xff]  ;;  %v111_v33 = vld [vmem:[#allocation5 + $0x108] sm:$0xff]  ;;  %v1428_v35 = vcombine.low %v102_v23, %v106_v24  ;;  %v1430_v36 = vcombine.low %v103_v25, %v107_v26  ;;  %v92_v10 = vld [vmem:[#allocation5 + $0x70] sm:$0xff] }
  0x54   :  { %507 = vmatpush1.bf16.msra.mxu0 %v1412_v19  ;;  %550 = vmatpush1.bf16.msra.mxu1 %v1414_v20  ;;  %v114_v32 = vld [vmem:[#allocation5 + $0x120] sm:$0xff]  ;;  %v115_v34 = vld [vmem:[#allocation5 + $0x128] sm:$0xff]  ;;  %v89_v12 = vld [vmem:[#allocation5 + $0x58] sm:$0xff]  ;;  %v1417_v18 = vcombine.high %v88_v7, %v92_v10  ;;  %v1416_v23 = vcombine.low %v88_v7, %v92_v10 }
  0x55   :  { %508 = vmatprep.subr.bf16.mxu0 %v1421_v21  ;;  %551 = vmatprep.subr.bf16.mxu1 %v1423_v22  ;;  %v1437_v37 = vcombine.high %v110_v31, %v114_v32  ;;  %v1439_v38 = vcombine.high %v111_v33, %v115_v34  ;;  %v118_v39 = vld [vmem:[#allocation5 + $0x140] sm:$0xff]  ;;  %v119_v41 = vld [vmem:[#allocation5 + $0x148] sm:$0xff]  ;;  %v1436_v43 = vcombine.low %v110_v31, %v114_v32  ;;  %v93_v14 = vld [vmem:[#allocation5 + $0x78] sm:$0xff] }
  0x56   :  { %v122_v40 = vld [vmem:[#allocation5 + $0x160] sm:$0xff]  ;;  %v123_v42 = vld [vmem:[#allocation5 + $0x168] sm:$0xff]  ;;  %v1438_v44 = vcombine.low %v111_v33, %v115_v34  ;;  %v96_v16 = vld [vmem:[#allocation5 + $0x90] sm:$0xff]  ;;  %v1419_v20 = vcombine.high %v89_v12, %v93_v14  ;;  %v1418_v25 = vcombine.low %v89_v12, %v93_v14 }
  0x57   :  { %v1445_v45 = vcombine.high %v118_v39, %v122_v40  ;;  %v1447_v46 = vcombine.high %v119_v41, %v123_v42  ;;  %v126_v47 = vld [vmem:[#allocation5 + $0x180] sm:$0xff]  ;;  %v127_v49 = vld [vmem:[#allocation5 + $0x188] sm:$0xff]  ;;  %v1444_v51 = vcombine.low %v118_v39, %v122_v40  ;;  %v1446_v52 = vcombine.low %v119_v41, %v123_v42  ;;  %v100_v19 = vld [vmem:[#allocation5 + $0xb0] sm:$0xff] }
  0x58   :  { %509 = vmatpush1.bf16.msra.mxu0 %v1420_v27  ;;  %552 = vmatpush1.bf16.msra.mxu1 %v1422_v28  ;;  %v130_v48 = vld [vmem:[#allocation5 + $0x1a0] sm:$0xff]  ;;  %v131_v50 = vld [vmem:[#allocation5 + $0x1a8] sm:$0xff]  ;;  %v97_v21 = vld [vmem:[#allocation5 + $0x98] sm:$0xff]  ;;  %v1425_v26 = vcombine.high %v96_v16, %v100_v19  ;;  %v1424_v31 = vcombine.low %v96_v16, %v100_v19 }
  0x59   :  { %510 = vmatprep.subr.bf16.mxu0 %v1429_v29  ;;  %553 = vmatprep.subr.bf16.mxu1 %v1431_v30  ;;  %v1453_v53 = vcombine.high %v126_v47, %v130_v48  ;;  %v134_v54 = vld [vmem:[#allocation5 + $0x1c0] sm:$0xff]  ;;  %v1455_v56 = vcombine.high %v127_v49, %v131_v50  ;;  %v135_v57 = vld [vmem:[#allocation5 + $0x1c8] sm:$0xff]  ;;  %v1452_v59 = vcombine.low %v126_v47, %v130_v48  ;;  %v101_v22 = vld [vmem:[#allocation5 + $0xb8] sm:$0xff] }
  0x5a   :  { %v138_v55 = vld [vmem:[#allocation5 + $0x1e0] sm:$0xff]  ;;  %v139_v58 = vld [vmem:[#allocation5 + $0x1e8] sm:$0xff]  ;;  %v1454_v61 = vcombine.low %v127_v49, %v131_v50  ;;  %v104_v24 = vld [vmem:[#allocation5 + $0xd0] sm:$0xff]  ;;  %v1427_v28 = vcombine.high %v97_v21, %v101_v22  ;;  %v1426_v33 = vcombine.low %v97_v21, %v101_v22 }
  0x5b   :  { %v1461_v62 = vcombine.high %v134_v54, %v138_v55  ;;  %v1463_v1 = vcombine.high %v135_v57, %v139_v58  ;;  %v1460_v6 = vcombine.low %v134_v54, %v138_v55  ;;  %v1462_v8 = vcombine.low %v135_v57, %v139_v58  ;;  %v108_v27 = vld [vmem:[#allocation5 + $0xf0] sm:$0xff]  ;;  %v105_v29 = vld [vmem:[#allocation5 + $0xd8] sm:$0xff]  ;;  %v1633_v3 = vld [vmem:[#allocation8 + $0x40] sm:$0xff]  }
  0x5c   :  { %511 = vmatpush1.bf16.msra.mxu0 %v1428_v35  ;;  %554 = vmatpush1.bf16.msra.mxu1 %v1430_v36  ;;  %v109_v30 = vld [vmem:[#allocation5 + $0xf8] sm:$0xff]  ;;  %v112_v32 = vld [vmem:[#allocation5 + $0x110] sm:$0xff]  ;;  %v1433_v34 = vcombine.high %v104_v24, %v108_v27  ;;  %v1432_v39 = vcombine.low %v104_v24, %v108_v27  ;;  %v1634_v5 = vld [vmem:[#allocation8 + $0xc0] sm:$0xff]  }
  0x5d   :  { %512 = vmatprep.subr.bf16.mxu0 %v1437_v37  ;;  %555 = vmatprep.subr.bf16.mxu1 %v1439_v38  ;;  %v116_v35 = vld [vmem:[#allocation5 + $0x130] sm:$0xff]  ;;  %v1435_v36 = vcombine.high %v105_v29, %v109_v30  ;;  %v113_v37 = vld [vmem:[#allocation5 + $0x118] sm:$0xff]  ;;  %v1434_v42 = vcombine.low %v105_v29, %v109_v30  ;;  %v1635_v7 = vld [vmem:[#allocation8] sm:$0xff]  }
  0x5e   :  { %v117_v38 = vld [vmem:[#allocation5 + $0x138] sm:$0xff]  ;;  %v120_v40 = vld [vmem:[#allocation5 + $0x150] sm:$0xff]  ;;  %v1646_v19 = vld [vmem:[#allocation8 + $0xd8] sm:$0xff]  }
  0x5f   :  { %v124_v41 = vld [vmem:[#allocation5 + $0x170] sm:$0xff]  ;;  %v1442_v49 = vcombine.low %v113_v37, %v117_v38  ;;  %v141_v60 = vld [vmem:[#allocation5 + $0x1f8] sm:$0xff]  ;;  %v1648_v21 = vld [vmem:[#allocation8 + $0x98] sm:$0xff]  }
  0x60   :  { %513 = vmatpush1.bf16.msra.mxu0 %v1436_v43  ;;  %556 = vmatpush1.bf16.msra.mxu1 %v1438_v44  ;;  %v121_v43 = vld [vmem:[#allocation5 + $0x158] sm:$0xff]  ;;  %v128_v47 = vld [vmem:[#allocation5 + $0x190] sm:$0xff]  ;;  %v1449_v50 = vcombine.high %v120_v40, %v124_v41  ;;  %v1448_v54 = vcombine.low %v120_v40, %v124_v41  ;;  %v1649_v22 = vld [vmem:[#allocation8 + $0x60] sm:$0xff]  }
  0x61   :  { %514 = vmatprep.subr.bf16.mxu0 %v1445_v45  ;;  %557 = vmatprep.subr.bf16.mxu1 %v1447_v46  ;;  %v125_v44 = vld [vmem:[#allocation5 + $0x178] sm:$0xff]  ;;  %v1443_v45 = vcombine.high %v113_v37, %v117_v38  ;;  %v1440_v46 = vcombine.low %v112_v32, %v116_v35  ;;  %v132_v48 = vld [vmem:[#allocation5 + $0x1b0] sm:$0xff]  ;;  %v1652_v24 = vld [vmem:[#allocation8 + $0xa0] sm:$0xff]  }
  0x62   :  { %v136_v55 = vld [vmem:[#allocation5 + $0x1d0] sm:$0xff]  ;;  %v1450_v57 = vcombine.low %v121_v43, %v125_v44  ;;  %v1457_v58 = vcombine.high %v128_v47, %v132_v48  ;;  %v1641_v14 = vld [vmem:[#allocation8 + $0x50] sm:$0xff]   ;;  %v1665_v37 = vld [vmem:[#allocation8 + $0x140] sm:$0xff]  }
  0x63   :  { %v1638_v10 = vld [vmem:[#allocation8 + $0xc8] sm:$0xff]   ;;  %v1643_v16 = vld [vmem:[#allocation8 + $0x10] sm:$0xff]   ;;  %v1666_v38 = vld [vmem:[#allocation8 + $0x1c0] sm:$0xff]  }
  0x64   :  { %515 = vmatpush1.bf16.msra.mxu0 %v1444_v51  ;;  %558 = vmatpush1.bf16.msra.mxu1 %v1446_v52  ;;  %v129_v51 = vld [vmem:[#allocation5 + $0x198] sm:$0xff]  ;;  %v1640_v12 = vld [vmem:[#allocation8 + $0x88] sm:$0xff]  }
  0x65   :  { %516 = vmatprep.subr.bf16.mxu0 %v1453_v53  ;;  %559 = vmatprep.subr.bf16.mxu1 %v1455_v56  ;;  %v133_v52 = vld [vmem:[#allocation5 + $0x1b8] sm:$0xff]  ;;  %v1451_v53 = vcombine.high %v121_v43, %v125_v44  ;;  %v140_v56 = vld [vmem:[#allocation5 + $0x1f0] sm:$0xff] }
  0x66   :  { %v1458_v63 = vcombine.low %v129_v51, %v133_v52  ;;  %v1464_v4 = vcombine.low %v136_v55, %v140_v56  ;;  %v1655_v27 = vld [vmem:[#allocation8 + $0x28] sm:$0xff]   ;;  %v1657_v29 = vld [vmem:[#allocation8 + $0x70] sm:$0xff]  }
  0x67   :  { %v1658_v30 = vld [vmem:[#allocation8 + $0xf0] sm:$0xff]  }
  0x68   :  { %517 = vmatpush1.bf16.msra.mxu0 %v1452_v59  ;;  %560 = vmatpush1.bf16.msra.mxu1 %v1454_v61  ;;  %v137_v59 = vld [vmem:[#allocation5 + $0x1d8] sm:$0xff]  ;;  %v1459_v61 = vcombine.high %v129_v51, %v133_v52 }
  0x69   :  { %518 = vmatprep.subr.bf16.mxu0 %v1461_v62  ;;  %561 = vmatprep.subr.bf16.mxu1 %v1463_v1  ;;  %v1456_v62 = vcombine.low %v128_v47, %v132_v48  ;;  %v1465_v1 = vcombine.high %v136_v55, %v140_v56  ;;  %v1467_v2 = vcombine.high %v137_v59, %v141_v60 }
  0x6c   :  { %519 = vmatpush1.bf16.msra.mxu0 %v1460_v6  ;;  %562 = vmatpush1.bf16.msra.mxu1 %v1462_v8  ;;  %v1466_v6 = vcombine.low %v137_v59, %v141_v60  ;;  %v1636_v8 = vld [vmem:[#allocation8 + $0x80] sm:$0xff]  }
  0x6d   :  { %590 = vmatprep.subr.bf16.mxu0 %v1409_v9  ;;  %633 = vmatprep.subr.bf16.mxu1 %v1411_v11  ;;  %v1637_v9 = vld [vmem:[#allocation8 + $0x48] sm:$0xff]  }
  0x6e   :  { %v1639_v11 = vld [vmem:[#allocation8 + $0x8] sm:$0xff]  }
  0x6f   :  { %537 = vmatmul.mubr.bf16.vlgmr.msra.gmra.mrb[0].mxu0 %v1917_v13  ;;  %580 = vmatmul.mubr.bf16.vlgmr.msra.gmra.mrb[0].mxu1 %v1917_v13 }
  0x70   :  { %591 = vmatpush1.bf16.msra.mxu0 %v1408_v15  ;;  %634 = vmatpush1.bf16.msra.mxu1 %v1410_v17  ;;  %v1642_v15 = vld [vmem:[#allocation8 + $0xd0] sm:$0xff]  }
  0x71   :  { %592 = vmatprep.subr.bf16.mxu0 %v1417_v18  ;;  %635 = vmatprep.subr.bf16.mxu1 %v1419_v20  ;;  %v1644_v17 = vld [vmem:[#allocation8 + $0x90] sm:$0xff]   ;;  %v1645_v18 = vld [vmem:[#allocation8 + $0x58] sm:$0xff]  }
  0x72   :  { %622 = vmatprep.mubr.bf16.mxu0 %v1825_v0  ;;  %665 = vmatprep.mubr.bf16.mxu1 %v1825_v0  ;;  %v1441_v0 = vcombine.high %v112_v32, %v116_v35  ;;  %v1647_v20 = vld [vmem:[#allocation8 + $0x18] sm:$0xff]   ;;  %v1660_v32 = vld [vmem:[#allocation8 + $0xb0] sm:$0xff]  }
  0x73   :  { %v1663_v35 = vld [vmem:[#allocation8 + $0x38] sm:$0xff]  }
  0x74   :  { %593 = vmatpush1.bf16.msra.mxu0 %v1416_v23  ;;  %636 = vmatpush1.bf16.msra.mxu1 %v1418_v25  ;;  %v1651_v23 = vld [vmem:[#allocation8 + $0x20] sm:$0xff]   ;;  %v1653_v25 = vld [vmem:[#allocation8 + $0x68] sm:$0xff]  }
  0x75   :  { %594 = vmatprep.subr.bf16.mxu0 %v1425_v26  ;;  %637 = vmatprep.subr.bf16.mxu1 %v1427_v28  ;;  %v1654_v26 = vld [vmem:[#allocation8 + $0xe8] sm:$0xff]  }
  0x76   :  { %v1656_v28 = vld [vmem:[#allocation8 + $0xa8] sm:$0xff]  }
  0x78   :  { %595 = vmatpush1.bf16.msra.mxu0 %v1424_v31  ;;  %638 = vmatpush1.bf16.msra.mxu1 %v1426_v33  ;;  %v1659_v31 = vld [vmem:[#allocation8 + $0x30] sm:$0xff]   ;;  %v1661_v33 = vld [vmem:[#allocation8 + $0x78] sm:$0xff]  }
  0x79   :  { %596 = vmatprep.subr.bf16.mxu0 %v1433_v34  ;;  %639 = vmatprep.subr.bf16.mxu1 %v1435_v36  ;;  %v1662_v34 = vld [vmem:[#allocation8 + $0xf8] sm:$0xff]  }
  0x7a   :  { %v1664_v36 = vld [vmem:[#allocation8 + $0xb8] sm:$0xff]  }
  0x7c   :  { %597 = vmatpush1.bf16.msra.mxu0 %v1432_v39  ;;  %640 = vmatpush1.bf16.msra.mxu1 %v1434_v42  ;;  %v144_v39 = vlaneseq  ;;  %v1928_v42 = vld [vmem:[#allocation7] sm:$0xff] }
  0x7d   :  { %598 = vmatprep.subr.bf16.mxu0 %v1441_v0  ;;  %641 = vmatprep.subr.bf16.mxu1 %v1443_v45 }
  0x7e   :  { %v1925_v40 = vshrl.u32 %v144_v39, 7 }
  0x80   :  { %599 = vmatpush1.bf16.msra.mxu0 %v1440_v46  ;;  %642 = vmatpush1.bf16.msra.mxu1 %v1442_v49  ;;  %v146_v41 = vsub.s32 0, %v1925_v40  ;;  %v154_v0 = vsub.s32 2, %v1925_v40  ;;  %v150_v43 = vsub.s32 1, %v1925_v40  ;;  %v158_v44 = vsub.s32 3, %v1925_v40 }
  0x81   :  { %600 = vmatprep.subr.bf16.mxu0 %v1449_v50  ;;  %643 = vmatprep.subr.bf16.mxu1 %v1451_v53 }
  0x82   :  { %v147_v45 = vrot.slane %v1928_v42, %v146_v41  ;;  %v155_v46 = vrot.slane %v1928_v42, %v154_v0  ;;  %v151_v47 = vrot.slane %v1928_v42, %v150_v43  ;;  %v159_v48 = vrot.slane %v1928_v42, %v158_v44  ;;  %v1688_v41 = vld [vmem:[#allocation8 + $0x1a8] sm:$0xff]   ;;  %v1689_v0 = vld [vmem:[#allocation8 + $0x170] sm:$0xff]  }
  0x84   :  { %601 = vmatpush1.bf16.msra.mxu0 %v1448_v54  ;;  %644 = vmatpush1.bf16.msra.mxu1 %v1450_v57 }
  0x85   :  { %602 = vmatprep.subr.bf16.mxu0 %v1457_v58  ;;  %645 = vmatprep.subr.bf16.mxu1 %v1459_v61 }
  0x88   :  { %603 = vmatpush1.bf16.msra.mxu0 %v1456_v62  ;;  %646 = vmatpush1.bf16.msra.mxu1 %v1458_v63 }
  0x89   :  { %604 = vmatprep.subr.bf16.mxu0 %v1465_v1  ;;  %647 = vmatprep.subr.bf16.mxu1 %v1467_v2 }
  0x8c   :  { %605 = vmatpush1.bf16.msra.mxu0 %v1464_v4  ;;  %648 = vmatpush1.bf16.msra.mxu1 %v1466_v6 }
  0x8d   :  { %1533 = vmatprep.subr.bf16.mxu0 %v1633_v3  ;;  %1555 = vmatprep.subr.bf16.mxu1 %v1634_v5 }
  0x8f   :  { %623 = vmatmul.mubr.bf16.vlgmr.msra.gmra.mrb[4].mxu0 %v1917_v13  ;;  %666 = vmatmul.mubr.bf16.vlgmr.msra.gmra.mrb[4].mxu1 %v1917_v13  ;;  %v1650_v13 = vld [vmem:[#allocation8 + $0xe0] sm:$0xff]  }
  0x90   :  { %1534 = vmatpush3.bf16.msra.mxu0 %v1635_v7  ;;  %1556 = vmatpush3.bf16.msra.mxu1 %v1636_v8 }
  0x91   :  { %1535 = vmatprep.subr.bf16.mxu0 %v1637_v9  ;;  %1557 = vmatprep.subr.bf16.mxu1 %v1638_v10 }
  0x94   :  { %1536 = vmatpush3.bf16.msra.mxu0 %v1639_v11  ;;  %1558 = vmatpush3.bf16.msra.mxu1 %v1640_v12 }
  0x95   :  { %1537 = vmatprep.subr.bf16.mxu0 %v1641_v14  ;;  %1559 = vmatprep.subr.bf16.mxu1 %v1642_v15  ;;  %v1667_v14 = vld [vmem:[#allocation8 + $0x100] sm:$0xff]  }
  0x98   :  { %1538 = vmatpush3.bf16.msra.mxu0 %v1643_v16  ;;  %1560 = vmatpush3.bf16.msra.mxu1 %v1644_v17  ;;  %v1668_v16 = vld [vmem:[#allocation8 + $0x180] sm:$0xff]   ;;  %v1669_v17 = vld [vmem:[#allocation8 + $0x148] sm:$0xff]  }
  0x99   :  { %1539 = vmatprep.subr.bf16.mxu0 %v1645_v18  ;;  %1561 = vmatprep.subr.bf16.mxu1 %v1646_v19  ;;  %v1670_v18 = vld [vmem:[#allocation8 + $0x1c8] sm:$0xff]  }
  0x9a   :  { %v1671_v19 = vld [vmem:[#allocation8 + $0x108] sm:$0xff]  }
  0x9c   :  { %1540 = vmatpush3.bf16.msra.mxu0 %v1647_v20  ;;  %1562 = vmatpush3.bf16.msra.mxu1 %v1648_v21  ;;  %v1672_v20 = vld [vmem:[#allocation8 + $0x188] sm:$0xff]   ;;  %v1673_v21 = vld [vmem:[#allocation8 + $0x150] sm:$0xff]  }
  0x9d   :  { %1541 = vmatprep.subr.bf16.mxu0 %v1649_v22  ;;  %1563 = vmatprep.subr.bf16.mxu1 %v1650_v13  ;;  %v1674_v22 = vld [vmem:[#allocation8 + $0x1d0] sm:$0xff]  }
  0x9e   :  { %v1675_v13 = vld [vmem:[#allocation8 + $0x110] sm:$0xff]  }
  0xa0   :  { %1542 = vmatpush3.bf16.msra.mxu0 %v1651_v23  ;;  %1564 = vmatpush3.bf16.msra.mxu1 %v1652_v24  ;;  %v1676_v23 = vld [vmem:[#allocation8 + $0x190] sm:$0xff]   ;;  %v1677_v24 = vld [vmem:[#allocation8 + $0x158] sm:$0xff]  }
  0xa1   :  { %1543 = vmatprep.subr.bf16.mxu0 %v1653_v25  ;;  %1565 = vmatprep.subr.bf16.mxu1 %v1654_v26  ;;  %v1678_v25 = vld [vmem:[#allocation8 + $0x1d8] sm:$0xff]  }
  0xa2   :  { %v1679_v26 = vld [vmem:[#allocation8 + $0x118] sm:$0xff]  }
  0xa4   :  { %1544 = vmatpush3.bf16.msra.mxu0 %v1655_v27  ;;  %1566 = vmatpush3.bf16.msra.mxu1 %v1656_v28  ;;  %v1680_v27 = vld [vmem:[#allocation8 + $0x198] sm:$0xff]   ;;  %v1681_v28 = vld [vmem:[#allocation8 + $0x160] sm:$0xff]  }
  0xa5   :  { %1545 = vmatprep.subr.bf16.mxu0 %v1657_v29  ;;  %1567 = vmatprep.subr.bf16.mxu1 %v1658_v30  ;;  %v1682_v29 = vld [vmem:[#allocation8 + $0x1e0] sm:$0xff]  }
  0xa6   :  { %v1683_v30 = vld [vmem:[#allocation8 + $0x120] sm:$0xff]  }
  0xa8   :  { %1546 = vmatpush3.bf16.msra.mxu0 %v1659_v31  ;;  %1568 = vmatpush3.bf16.msra.mxu1 %v1660_v32  ;;  %v1684_v31 = vld [vmem:[#allocation8 + $0x1a0] sm:$0xff]   ;;  %v1685_v32 = vld [vmem:[#allocation8 + $0x168] sm:$0xff]  }
  0xa9   :  { %1547 = vmatprep.subr.bf16.mxu0 %v1661_v33  ;;  %1569 = vmatprep.subr.bf16.mxu1 %v1662_v34  ;;  %v162_v33 = vsub.s32 4, %v1925_v40  ;;  %v1686_v34 = vld [vmem:[#allocation8 + $0x1e8] sm:$0xff]  }
  0xab   :  { %v163_v39 = vrot.slane %v1928_v42, %v162_v33 }
  0xac   :  { %1548 = vmatpush3.bf16.msra.mxu0 %v1663_v35  ;;  %1570 = vmatpush3.bf16.msra.mxu1 %v1664_v36  ;;  %v170_v35 = vsub.s32 6, %v1925_v40  ;;  %v166_v36 = vsub.s32 5, %v1925_v40 }
  0xad   :  { %1577 = vmatprep.subr.bf16.mxu0 %v1665_v37  ;;  %1599 = vmatprep.subr.bf16.mxu1 %v1666_v38  ;;  %v174_v37 = vsub.s32 7, %v1925_v40  ;;  %v1687_v38 = vld [vmem:[#allocation8 + $0x128] sm:$0xff]  }
  0xae   :  { %v171_v43 = vrot.slane %v1928_v42, %v170_v35  ;;  %v167_v44 = vrot.slane %v1928_v42, %v166_v36 }
 0x142   :  { %v538_v49 = vpop.f32.mrb[0].mxu0  ;;  %v581_v51 = vpop.f32.mrb[0].mxu1 }
 0x143   :  { %v539_v50 = vadd.f32 %v538_v49, %v147_v45  ;;  %v540_v52 = vpop.f32.mrb[1].mxu0  ;;  %v582_v53 = vadd.f32 %v581_v51, %v155_v46  ;;  %v583_v55 = vpop.f32.mrb[1].mxu1  ;;  %v1692_v51 = vld [vmem:[#allocation8 + $0x1b0] sm:$0xff]  }
 0x144   :  { %v541_v54 = vadd.f32 %v540_v52, %v151_v47  ;;  %v542_v56 = vpop.f32.mrb[2].mxu0  ;;  %v584_v58 = vadd.f32 %v583_v55, %v159_v48  ;;  %v585_v60 = vpop.f32.mrb[2].mxu1  ;;  %v1693_v52 = vld [vmem:[#allocation8 + $0x178] sm:$0xff]  }
 0x145   :  { %v676_v57 = vmax.f32 %v539_v50, 0.0  ;;  %v543_v59 = vadd.f32 %v542_v56, %v147_v45  ;;  %v544_v61 = vpop.f32.mrb[3].mxu0  ;;  %v678_v62 = vmax.f32 %v582_v53, 0.0  ;;  %v586_v63 = vadd.f32 %v585_v60, %v155_v46  ;;  %v587_v2 = vpop.f32.mrb[3].mxu1  ;;  %v1690_v45 = vld [vmem:[#allocation8 + $0x1f0] sm:$0xff]  }
 0x146   :  { %v545_v1 = vadd.f32 %v544_v61, %v151_v47  ;;  %v679_v3 = vmax.f32 %v584_v58, 0.0  ;;  %v588_v5 = vadd.f32 %v587_v2, %v159_v48  ;;  %v677_v6 = vmax.f32 %v541_v54, 0.0  ;;  %v1691_v48 = vld [vmem:[#allocation8 + $0x130] sm:$0xff]   ;;  %v1695_v2 = vld [vmem:[#allocation8 + $0x138] sm:$0xff]  }
 0x147   :  { %v684_v4 = vmax.f32 %v543_v59, 0.0  ;;  %v686_v7 = vmax.f32 %v586_v63, 0.0  ;;  %v175_v46 = vrot.slane %v1928_v42, %v174_v37 }
 0x148   :  { %v685_v8 = vmax.f32 %v545_v1, 0.0  ;;  %v687_v10 = vmax.f32 %v588_v5, 0.0 }
 0x149   :  { %v692_v9 = vpack.c.bf16 %v684_v4, %v676_v57  ;;  %v694_v11 = vpack.c.bf16 %v686_v7, %v678_v62  ;;  %v1694_v57 = vld [vmem:[#allocation8 + $0x1f8] sm:$0xff]  }
 0x14a   :  { %v693_v12 = vpack.c.bf16 %v685_v8, %v677_v6  ;;  %v695_v15 = vpack.c.bf16 %v687_v10, %v679_v3  ;;  %v1696_v7 = vld [vmem:[#allocation8 + $0x1b8] sm:$0xff]  }
 0x14c   :  { %1251 = vmatprep.mubr.bf16.mxu0 %v693_v12  ;;  %1292 = vmatprep.mubr.bf16.mxu1 %v695_v15 }
 0x14d   :  { %1252 = vmatmul.mubr.bf16.vlgmr.msra.gmra.mrb[8].mxu0 %v692_v9  ;;  %1293 = vmatmul.mubr.bf16.vlgmr.msra.gmra.mrb[8].mxu1 %v694_v11 }
 0x14e   :  { %1578 = vmatpush3.bf16.msra.mxu0 %v1667_v14  ;;  %1600 = vmatpush3.bf16.msra.mxu1 %v1668_v16 }
 0x14f   :  { %1579 = vmatprep.subr.bf16.mxu0 %v1669_v17  ;;  %1601 = vmatprep.subr.bf16.mxu1 %v1670_v18 }
 0x152   :  { %1580 = vmatpush3.bf16.msra.mxu0 %v1671_v19  ;;  %1602 = vmatpush3.bf16.msra.mxu1 %v1672_v20  ;;  %v1468_v19 = vld [vmem:[%s1967_s4] ss:$0 sm:$0xff]  ;;  %s1826_s4 = smov [#allocation10]  }
 0x153   :  { %1581 = vmatprep.subr.bf16.mxu0 %v1673_v21  ;;  %1603 = vmatprep.subr.bf16.mxu1 %v1674_v22  ;;  %s1390_s21 = sshll.u32 %s1826_s4, 4  ;;  %s1391_s21 = int_to_ptr.vmem [resolvable:$true] %s1390_s21 }
 0x154   :  { %s1785_s22 = scalar_lea.vmem %s1391_s21, 256  ;;  %p1790_p5 = scmp.lt.s32.totalorder %s1391_s21, %s1391_s21 }
 0x155   :  { %p1786_p4 = scmp.ne.s32.totalorder %s1391_s21, %s1785_s22  ;;  %p1791_p6 = scmp.lt.s32.totalorder %s1785_s22, %s1785_s22 }
 0x156   :  { %1582 = vmatpush3.bf16.msra.mxu0 %v1675_v13  ;;  %1604 = vmatpush3.bf16.msra.mxu1 %v1676_v23 }
 0x157   :  { %1583 = vmatprep.subr.bf16.mxu0 %v1677_v24  ;;  %1605 = vmatprep.subr.bf16.mxu1 %v1678_v25  ;;  %p1792_p7 = por %p1791_p6, %p1790_p5 }
 0x159   :  { %p1793_p8 = pnand %p1792_p7, %p1786_p4 }
 0x15a   :  { %1584 = vmatpush3.bf16.msra.mxu0 %v1679_v26  ;;  %1606 = vmatpush3.bf16.msra.mxu1 %v1680_v27 }
 0x15b   :  { %1585 = vmatprep.subr.bf16.mxu0 %v1681_v28  ;;  %1607 = vmatprep.subr.bf16.mxu1 %v1682_v29 }
 0x15e   :  { %1586 = vmatpush3.bf16.msra.mxu0 %v1683_v30  ;;  %1608 = vmatpush3.bf16.msra.mxu1 %v1684_v31 }
 0x15f   :  { %1587 = vmatprep.subr.bf16.mxu0 %v1685_v32  ;;  %1609 = vmatprep.subr.bf16.mxu1 %v1686_v34 }
 0x162   :  { %v624_v47 = vpop.f32.mrb[4].mxu0  ;;  %1588 = vmatpush3.bf16.msra.mxu0 %v1687_v38  ;;  %v667_v49 = vpop.f32.mrb[4].mxu1  ;;  %1610 = vmatpush3.bf16.msra.mxu1 %v1688_v41 }
 0x163   :  { %v625_v40 = vadd.f32 %v624_v47, %v163_v39  ;;  %v626_v50 = vpop.f32.mrb[5].mxu0  ;;  %1589 = vmatprep.subr.bf16.mxu0 %v1689_v0  ;;  %v668_v53 = vadd.f32 %v667_v49, %v171_v43  ;;  %v669_v55 = vpop.f32.mrb[5].mxu1  ;;  %1611 = vmatprep.subr.bf16.mxu1 %v1690_v45 }
 0x164   :  { %v627_v54 = vadd.f32 %v626_v50, %v167_v44  ;;  %v628_v56 = vpop.f32.mrb[6].mxu0  ;;  %v670_v58 = vadd.f32 %v669_v55, %v175_v46  ;;  %v671_v60 = vpop.f32.mrb[6].mxu1 }
 0x165   :  { %v629_v59 = vadd.f32 %v628_v56, %v163_v39  ;;  %v630_v42 = vpop.f32.mrb[7].mxu0  ;;  %v682_v61 = vmax.f32 %v668_v53, 0.0  ;;  %v672_v62 = vadd.f32 %v671_v60, %v171_v43  ;;  %v673_v1 = vpop.f32.mrb[7].mxu1  ;;  %v680_v3 = vmax.f32 %v625_v40, 0.0 }
 0x166   :  { %v631_v63 = vadd.f32 %v630_v42, %v167_v44  ;;  %1590 = vmatpush3.bf16.msra.mxu0 %v1691_v48  ;;  %v683_v4 = vmax.f32 %v670_v58, 0.0  ;;  %v674_v6 = vadd.f32 %v673_v1, %v175_v46  ;;  %1612 = vmatpush3.bf16.msra.mxu1 %v1692_v51  ;;  %v681_v8 = vmax.f32 %v627_v54, 0.0 }
 0x167   :  { %v688_v5 = vmax.f32 %v629_v59, 0.0  ;;  %1591 = vmatprep.subr.bf16.mxu0 %v1693_v52  ;;  %v690_v9 = vmax.f32 %v672_v62, 0.0  ;;  %1613 = vmatprep.subr.bf16.mxu1 %v1694_v57 }
 0x168   :  { %v689_v10 = vmax.f32 %v631_v63, 0.0  ;;  %v691_v12 = vmax.f32 %v674_v6, 0.0 }
 0x169   :  { %v696_v11 = vpack.c.bf16 %v688_v5, %v680_v3  ;;  %v698_v14 = vpack.c.bf16 %v690_v9, %v682_v61 }
 0x16a   :  { %v697_v15 = vpack.c.bf16 %v689_v10, %v681_v8  ;;  %1592 = vmatpush3.bf16.msra.mxu0 %v1695_v2  ;;  %v699_v16 = vpack.c.bf16 %v691_v12, %v683_v4  ;;  %1614 = vmatpush3.bf16.msra.mxu1 %v1696_v7 }
 0x16c   :  { %1333 = vmatprep.mubr.bf16.mxu0 %v697_v15  ;;  %1374 = vmatprep.mubr.bf16.mxu1 %v699_v16 }
 0x16d   :  { %1334 = vmatmul.mubr.bf16.vlgmr.msra.gmra.mrb[12].mxu0 %v696_v11  ;;  %1375 = vmatmul.mubr.bf16.vlgmr.msra.gmra.mrb[12].mxu1 %v698_v14 }
 0x220   :  { %v1549_v17 = vpop.f32.mrb[8].mxu0  ;;  %v1571_v18 = vpop.f32.mrb[8].mxu1 }
 0x221   :  { %v1550_v20 = vpop.f32.mrb[9].mxu0  ;;  %v1572_v22 = vpop.f32.mrb[9].mxu1 }
 0x222   :  { %v1551_v21 = vadd.f32 %v1550_v20, %v1549_v17  ;;  %v1552_v13 = vpop.f32.mrb[10].mxu0  ;;  %v1573_v23 = vadd.f32 %v1572_v22, %v1571_v18  ;;  %v1574_v24 = vpop.f32.mrb[10].mxu1 }
 0x223   :  { %v1553_v25 = vpop.f32.mrb[11].mxu0  ;;  %v1575_v28 = vpop.f32.mrb[11].mxu1 }
 0x224   :  { %v1254_v26 = vadd.f32 %v1551_v21, %v1468_v19  ;;  %v1554_v27 = vadd.f32 %v1553_v25, %v1552_v13  ;;  %v1576_v29 = vadd.f32 %v1575_v28, %v1574_v24 }
 0x226   :  { %v1295_v30 = vadd.f32 %v1573_v23, %v1254_v26  ;;  %v1257_v31 = vadd.f32 %v1554_v27, %v1468_v19 }
 0x228   :  { %v1298_v32 = vadd.f32 %v1576_v29, %v1257_v31 }
 0x240   :  { %v1593_v33 = vpop.f32.mrb[12].mxu0  ;;  %v1615_v34 = vpop.f32.mrb[12].mxu1 }
 0x241   :  { %v1594_v35 = vpop.f32.mrb[13].mxu0  ;;  %v1616_v37 = vpop.f32.mrb[13].mxu1 }
 0x242   :  { %v1595_v36 = vadd.f32 %v1594_v35, %v1593_v33  ;;  %v1596_v38 = vpop.f32.mrb[14].mxu0  ;;  %v1617_v39 = vadd.f32 %v1616_v37, %v1615_v34  ;;  %v1618_v41 = vpop.f32.mrb[14].mxu1 }
 0x243   :  { %v1597_v0 = vpop.f32.mrb[15].mxu0  ;;  %v1619_v45 = vpop.f32.mrb[15].mxu1 }
 0x244   :  { %v1336_v43 = vadd.f32 %v1595_v36, %v1295_v30  ;;  %v1598_v44 = vadd.f32 %v1597_v0, %v1596_v38  ;;  %v1620_v46 = vadd.f32 %v1619_v45, %v1618_v41 }
 0x246   :  { %v1377_v47 = vadd.f32 %v1617_v39, %v1336_v43  ;;  %v1339_v48 = vadd.f32 %v1598_v44, %v1298_v32 }
 0x248   :  { %1383 = vst [vmem:[#allocation10] sm:$0xff] %v1377_v47  ;;  %v1380_v40 = vadd.f32 %v1620_v46, %v1339_v48 }
 0x24a   :  { %1384 = vst [vmem:[#allocation10 + $0x8] sm:$0xff] %v1380_v40 }
 0x24b   :  { %1796 = shalt.err (!%p1793_p8)
}
 0x24c   :  { %s1797_s25 = scalar_lea.hbm %s1968_s5, 256 }
 0x24d   :  { %p1798_p9 = scmp.ne.s32.totalorder %s1968_s5, %s1797_s25  ;;  %p1801_p10 = scmp.lt.u32.totalorder %s1797_s25, %s1968_s5 }
 0x24f   :  { %p1803_p11 = pnand %p1801_p10, %p1798_p9 }
 0x251   :  { %1806 = shalt.err (!%p1803_p11)
}
 0x252   :  { %1396 = dma.vmem_to_hbm [thread:$0]  %s1391_s21, 256, %s1968_s5, [#allocation4], %s1819_s1, %s1819_s1, %s1820_s17  }
 0x253   :  { %1813 = dma.done.wait [#allocation4], 256  }
 0x254   :  { %1814 = vsyncadd [#allocation4], 4294967040 }
 0x255   :  { %1400 = vsyncpa [#allocation3], 1 }
 0x256   :  { %1401 = vsyncpa [#allocation6], 1 }
 0x257   :  { %1402 = vsyncpa [#allocation9], 1 }
 0x258   :  { %1403 = vsyncpa [#allocation4], 1 }

</bundles_post_ra>
